<compile_context>
chip_gen: v5e
topology: v5e:2x2
jax: 0.10.0
libtpu: 0.0.40
codegen_flags: <defaults>
</compile_context>

<pallas_src>
import jax
import jax.numpy as jnp
from jax import lax
from jax.experimental import pallas as pl
from jax.experimental.pallas import tpu as pltpu


# ------------------------------ kernel bodies ------------------------------ #
def _make_kernel(has_bias: bool, single_k: bool):
    """Build the fused linear + bias + ReLU kernel body."""
    # Contract dim 1 of x (tm, tk) with dim 1 of weight (tn, tk): x @ W.T.
    # TODO(synk): if a bundle dump ever shows a per-tile vxpose of the weight
    # block on some generation, switch to a one-time (K, N) weight relayout.
    dims = (((1,), (1,)), ((), ()))

    if single_k:
        # K fits in a single block: no accumulator scratch / zero-init / readback.
        def kernel(x_ref, w_ref, *rest):
            if has_bias:
                b_ref, o_ref = rest
            else:
                (o_ref,) = rest
            acc = lax.dot_general(
                x_ref[...], w_ref[...],
                dimension_numbers=dims,
                preferred_element_type=jnp.float32,
            )
            if has_bias:
                acc = acc + b_ref[...].astype(jnp.float32)
            o_ref[...] = jnp.maximum(acc, 0.0).astype(o_ref.dtype)

        return kernel

    def kernel(x_ref, w_ref, *rest):
        if has_bias:
            b_ref, o_ref, acc_ref = rest
        else:
            o_ref, acc_ref = rest

        k = pl.program_id(2)

        @pl.when(k == 0)
        def _():
            acc_ref[...] = jnp.zeros_like(acc_ref)

        acc_ref[...] += lax.dot_general(
            x_ref[...], w_ref[...],
            dimension_numbers=dims,
            preferred_element_type=jnp.float32,
        )

        @pl.when(k == pl.num_programs(2) - 1)
        def _():
            lin = acc_ref[...]
            if has_bias:
                lin = lin + b_ref[...].astype(jnp.float32)
            o_ref[...] = jnp.maximum(lin, 0.0).astype(o_ref.dtype)

    return kernel


# ------------------------------ tile selection ------------------------------ #
def _round_up(x, m):
    return ((x + m - 1) // m) * m


def _tpu_generation():
    try:
        kind = jax.devices()[0].device_kind.lower()
    except Exception:
        kind = ""
    if "v7" in kind:
        return "v7x"
    if "v6" in kind:
        return "v6e"
    if "v5 lite" in kind or "v5lite" in kind or "v5e" in kind:
        return "v5e"
    return "other"


def _vmem_budget_bytes(gen):
    if gen == "v7x":
        return 48 * 1024 * 1024          # 64 MiB physical; leave internal headroom
    if gen in ("v6e", "v5e"):
        return 96 * 1024 * 1024          # 128 MiB physical
    try:
        cap = pltpu.get_tpu_info().vmem_capacity_bytes
        return int(cap * 3 // 4)
    except Exception:
        return 32 * 1024 * 1024


# MXU-aligned, power-of-two tile candidates (descending), per generation.
_TILE_CANDIDATES = {
    "v6e":   dict(tm=(2048, 1024, 512, 256, 128), tn=(2048, 1024, 512, 256, 128),
                  tk=(2048, 1024, 512, 256, 128)),
    "v7x":   dict(tm=(1024, 512, 256, 128), tn=(1024, 512, 256, 128),
                  tk=(2048, 1024, 512, 256, 128)),
    "v5e":   dict(tm=(512, 256, 128), tn=(512, 256, 128),
                  tk=(2048, 1024, 512, 256, 128)),
    "other": dict(tm=(512, 256, 128), tn=(512, 256, 128),
                  tk=(1024, 512, 256, 128)),
}


def _pick_tile(dim, candidates, granularity):
    """candidates sorted descending; returns a tile size (dim may need padding)."""
    if dim <= candidates[0]:
        return _round_up(dim, granularity)          # collapse axis into one block
    for c in candidates:                            # exact divisor among big tiles
        if 4 * c >= candidates[0] and dim % c == 0:
            return c
    for c in candidates:                            # <= 12.5% padding waste
        if (_round_up(dim, c) - dim) * 8 <= dim:
            return c
    return candidates[0]


def _vmem_bytes(tm, tn, tk, itemsize, has_bias, single_k):
    # Inputs/outputs are double-buffered by the Pallas pipeline; the (1, tn)
    # bias block pads its sublane dim to 8 in VMEM.
    per_buf = tm * tk + tn * tk + tm * tn + (8 * tn if has_bias else 0)
    total = 2 * per_buf * itemsize
    if not single_k:
        total += tm * tn * 4                        # f32 accumulator scratch
    return total


def _choose_tiles(M, N, K, itemsize, has_bias, gen, budget):
    # Dtype-aware sublane minimum so packed vregs stay full (f32:8, bf16:16, i8:32).
    min_m = {4: 8, 2: 16, 1: 32}.get(itemsize, 8)
    cands = _TILE_CANDIDATES.get(gen, _TILE_CANDIDATES["other"])

    tm = _pick_tile(M, cands["tm"], min_m)
    tn = _pick_tile(N, cands["tn"], 128)
    tk = _pick_tile(K, cands["tk"], 128)

    # v7x has 2 TensorCores: make sure the parallel grid axes give both work.
    if gen == "v7x" and _round_up(M, tm) == tm and _round_up(N, tn) == tn:
        if N >= 256:
            half = ((_round_up(N, 128) // 2) // 128) * 128
            tn = max(128, half)
        elif M >= 2 * min_m:
            half = ((_round_up(M, min_m) // 2) // min_m) * min_m
            tm = max(min_m, half)

    def fits(a, b, c):
        single_k = _round_up(K, c) == c
        return _vmem_bytes(a, b, c, itemsize, has_bias, single_k) <= budget

    # Shrink until the double-buffered working set fits the VMEM budget.
    while not fits(tm, tn, tk):
        if tk > 256:
            tk = max(128, _round_up(tk // 2, 128))
        elif tn > 256:
            tn = max(128, _round_up(tn // 2, 128))
        elif tm > 2 * min_m:
            tm = max(min_m, _round_up(tm // 2, min_m))
        elif tk > 128:
            tk = 128
        elif tn > 128:
            tn = 128
        elif tm > min_m:
            tm = min_m
        else:
            break
    return tm, tn, tk


# --------------------------------- wrapper ---------------------------------- #
def lgr_linear_forward(x, weight, bias=None):
    """Forward of LGRLinear: relu(x @ weight.T + bias).

    x:      (..., K)
    weight: (N, K)   (PyTorch (out_features, in_features) layout — no transpose)
    bias:   (N,) or None
    """
    orig_shape = x.shape
    K = orig_shape[-1]
    x2 = x.reshape(-1, K)
    M = x2.shape[0]
    N, K2 = weight.shape
    assert K == K2, "in_features mismatch between x and weight"

    has_bias = bias is not None
    itemsize = jnp.dtype(x.dtype).itemsize
    gen = _tpu_generation()
    budget = _vmem_budget_bytes(gen)
    tm, tn, tk = _choose_tiles(M, N, K, itemsize, has_bias, gen, budget)

    Mp, Np, Kp = _round_up(M, tm), _round_up(N, tn), _round_up(K, tk)
    single_k = (Kp == tk)

    # Zero-pad odd shapes so every tile is full-size and lane-dense (sliced after).
    if (Mp, Kp) != (M, K):
        x2 = jnp.pad(x2, ((0, Mp - M), (0, Kp - K)))
    w = weight
    if (Np, Kp) != (N, K):
        w = jnp.pad(weight, ((0, Np - N), (0, Kp - K)))
    operands = [x2, w]
    if has_bias:
        b2 = bias.reshape(1, N)
        if Np != N:
            b2 = jnp.pad(b2, ((0, 0), (0, Np - N)))
        operands.append(b2)

    m_blocks, n_blocks, k_blocks = Mp // tm, Np // tn, Kp // tk

    if single_k:
        grid = (m_blocks, n_blocks)
        x_spec = pl.BlockSpec((tm, tk), lambda i, j: (i, 0))
        w_spec = pl.BlockSpec((tn, tk), lambda i, j: (j, 0))
        b_spec = pl.BlockSpec((1, tn), lambda i, j: (0, j))
        o_spec = pl.BlockSpec((tm, tn), lambda i, j: (i, j))
        scratch = []
        semantics = ("parallel", "parallel")
    else:
        grid = (m_blocks, n_blocks, k_blocks)
        x_spec = pl.BlockSpec((tm, tk), lambda i, j, k: (i, k))
        w_spec = pl.BlockSpec((tn, tk), lambda i, j, k: (j, k))
        b_spec = pl.BlockSpec((1, tn), lambda i, j, k: (0, j))
        o_spec = pl.BlockSpec((tm, tn), lambda i, j, k: (i, j))
        scratch = [pltpu.VMEM((tm, tn), jnp.float32)]
        semantics = ("parallel", "parallel", "arbitrary")

    in_specs = [x_spec, w_spec] + ([b_spec] if has_bias else [])

    needed = _vmem_bytes(tm, tn, tk, itemsize, has_bias, single_k)
    vmem_limit = int(min(max(2 * needed, 32 * 1024 * 1024), budget))

    # Realistic byte count: operands are re-read once per opposing block axis.
    bytes_accessed = (M * K * itemsize) * n_blocks \
                     + (N * K * itemsize) * m_blocks \
                     + M * N * itemsize \
                     + (N * itemsize if has_bias else 0)
    cost = pl.CostEstimate(
        flops=2 * M * N * K,
        transcendentals=0,
        bytes_accessed=int(bytes_accessed),
    )

    out = pl.pallas_call(
        _make_kernel(has_bias, single_k),
        out_shape=jax.ShapeDtypeStruct((Mp, Np), x.dtype),
        grid_spec=pltpu.PrefetchScalarGridSpec(
            num_scalar_prefetch=0,
            grid=grid,
            in_specs=in_specs,
            out_specs=o_spec,
            scratch_shapes=scratch,
        ),
        compiler_params=pltpu.CompilerParams(
            dimension_semantics=semantics,
            vmem_limit_bytes=vmem_limit,
        ),
        cost_estimate=cost,
    )(*operands)

    out = out[:M, :N]
    return out.reshape(orig_shape[:-1] + (N,))


# -------------------------------- param init -------------------------------- #
def init_lgr_linear_params(key, in_features, out_features, dtype=jnp.float32):
    """Matches nn.init.kaiming_uniform_(a=sqrt(5)) + zero bias."""
    # kaiming_uniform with a=sqrt(5): bound = sqrt(6 / ((1 + a^2) * fan_in))
    #                                       = 1 / sqrt(fan_in)
    bound = 1.0 / (in_features ** 0.5)
    weight = jax.random.uniform(
        key, (out_features, in_features), minval=-bound, maxval=bound, dtype=dtype
    )
    bias = jnp.zeros((out_features,), dtype=dtype)
    return weight, bias


# TODO(synk): the l/k/p hyperparameters of LGRLinearFunction only alter the
# custom *backward* pass; the forward computed here is unaffected by them.

if __name__ == "__main__":
    key = jax.random.PRNGKey(0)
    k_x1, k_w1, k_b1, k_x2, k_w2, k_x3, k_w3, k_b3 = jax.random.split(key, 8)
    hi = jax.lax.Precision.HIGHEST

    # Case 1: aligned shapes, with (non-zero) bias -> single-K fast path.
    batch, in_features, out_features = 16, 256, 128
    x = jax.random.normal(k_x1, (batch, in_features), dtype=jnp.float32)
    weight, _ = init_lgr_linear_params(k_w1, in_features, out_features)
    bias = 0.1 * jax.random.normal(k_b1, (out_features,), dtype=jnp.float32)
    out = jax.block_until_ready(lgr_linear_forward(x, weight, bias))
    ref = jnp.maximum(jnp.dot(x, weight.T, precision=hi) + bias, 0.0)
    assert out.shape == (batch, out_features)
    assert jnp.allclose(out, ref, atol=1e-4, rtol=1e-4)

    # Case 2: odd shapes, no bias -> exercises padding + bias-free kernel.
    x2 = jax.random.normal(k_x2, (5, 96), dtype=jnp.float32)
    w2, _ = init_lgr_linear_params(k_w2, 96, 40)
    out2 = jax.block_until_ready(lgr_linear_forward(x2, w2, None))
    ref2 = jnp.maximum(jnp.dot(x2, w2.T, precision=hi), 0.0)
    assert out2.shape == (5, 40)
    assert jnp.allclose(out2, ref2, atol=1e-4, rtol=1e-4)

    # Case 3: large K -> multi-K accumulation path with f32 scratch.
    x3 = jax.random.normal(k_x3, (8, 4096), dtype=jnp.float32)
    w3, _ = init_lgr_linear_params(k_w3, 4096, 256)
    b3 = 0.1 * jax.random.normal(k_b3, (256,), dtype=jnp.float32)
    out3 = jax.block_until_ready(lgr_linear_forward(x3, w3, b3))
    ref3 = jnp.maximum(jnp.dot(x3, w3.T, precision=hi) + b3, 0.0)
    assert out3.shape == (8, 256)
    assert jnp.allclose(out3, ref3, atol=1e-4, rtol=1e-4)

    print("KERNEL_OK")
</pallas_src>

<mosaic_0001>
module attributes {stable_mosaic.version = 11 : i64} {
  func.func @kernel(%arg0: i32, %arg1: i32, %arg2: memref<16x256xf32, #tpu.memory_space<vmem>>, %arg3: memref<128x256xf32, #tpu.memory_space<vmem>>, %arg4: memref<1x128xf32, #tpu.memory_space<vmem>>, %arg5: memref<16x128xf32, #tpu.memory_space<vmem>>) attributes {dimension_semantics = [#tpu.dimension_semantics<parallel>, #tpu.dimension_semantics<parallel>], iteration_bounds = array<i64: 1, 1>, scalar_prefetch = 0 : i64, scratch_operands = 0 : i64, tpu.core_type = #tpu.core_type<tc>, window_params = [{transform_indices = @transform_0, window_bounds = array<i64: 16, 256>}, {transform_indices = @transform_1, window_bounds = array<i64: 128, 256>}, {transform_indices = @transform_2, window_bounds = array<i64: 1, 128>}, {transform_indices = @transform_3, window_bounds = array<i64: 16, 128>}]} {
    %c0 = arith.constant 0 : index
    %c0_0 = arith.constant 0 : index
    %0 = vector.load %arg2[%c0, %c0_0] : memref<16x256xf32, #tpu.memory_space<vmem>>, vector<16x256xf32>
    %c0_1 = arith.constant 0 : index
    %c0_2 = arith.constant 0 : index
    %1 = vector.load %arg3[%c0_1, %c0_2] : memref<128x256xf32, #tpu.memory_space<vmem>>, vector<128x256xf32>
    %cst = arith.constant dense<0.000000e+00> : vector<16x128xf32>
    %2 = tpu.matmul %0, %1, %cst {dimension_numbers = #tpu.dot_dimension_numbers<[1], [1], [0], [0], [0, 0, 1, 0], [], []>} : vector<16x256xf32>, vector<128x256xf32>, vector<16x128xf32> -> vector<16x128xf32>
    %c0_3 = arith.constant 0 : index
    %c0_4 = arith.constant 0 : index
    %3 = vector.load %arg4[%c0_3, %c0_4] : memref<1x128xf32, #tpu.memory_space<vmem>>, vector<1x128xf32>
    %4 = vector.broadcast %3 : vector<1x128xf32> to vector<16x128xf32>
    %5 = arith.addf %2, %4 : vector<16x128xf32>
    %cst_5 = arith.constant 0.000000e+00 : f32
    %6 = vector.broadcast %cst_5 : f32 to vector<16x128xf32>
    %7 = arith.maximumf %5, %6 : vector<16x128xf32>
    %c0_6 = arith.constant 0 : index
    %c0_7 = arith.constant 0 : index
    %8 = vector.load %arg5[%c0_6, %c0_7] : memref<16x128xf32, #tpu.memory_space<vmem>>, vector<16x128xf32>
    tpu.vector_store %arg5[%c0_6, %c0_7], %7 {strides = array<i32>} : memref<16x128xf32, #tpu.memory_space<vmem>>, vector<16x128xf32>,
    return
  }
  func.func @transform_0(%arg0: i32, %arg1: i32) -> (i32, i32) {
    %c0_i32 = arith.constant 0 : i32
    %c0_i32_0 = arith.constant 0 : i32
    return %arg0, %c0_i32 : i32, i32
  }
  func.func @transform_1(%arg0: i32, %arg1: i32) -> (i32, i32) {
    %c0_i32 = arith.constant 0 : i32
    %c0_i32_0 = arith.constant 0 : i32
    return %arg1, %c0_i32 : i32, i32
  }
  func.func @transform_2(%arg0: i32, %arg1: i32) -> (i32, i32) {
    %c0_i32 = arith.constant 0 : i32
    %c0_i32_0 = arith.constant 0 : i32
    return %c0_i32, %arg1 : i32, i32
  }
  func.func @transform_3(%arg0: i32, %arg1: i32) -> (i32, i32) {
    %c0_i32 = arith.constant 0 : i32
    return %arg0, %arg1 : i32, i32
  }
}

</mosaic_0001>

<bundles_post_ra>
// kernel: tpu_custom_call.1
= control target key start
LH: loop header
LB: loop body
LE: loop exit
PB: predicated region body
PF: predicated region fallthrough
CT: control target
= control target key end

     0   :  { %8 = vsyncpa [#allocation3], 0  ;;  %s314_s0 = inlined_call_operand.hbm [shape: f32[16,256], index: 0, kind: input, shape index: {}]   ;;  %s315_s1 = inlined_call_operand.hbm [shape: f32[128,256], index: 1, kind: input, shape index: {}]   ;;  %s316_s2 = inlined_call_operand.vmem [shape: f32[1,128], index: 2, kind: input, shape index: {}]   ;;  %s317_s3 = inlined_call_operand.hbm [shape: f32[16,128], index: 3, kind: output, shape index: {}]  }
   0x1   :  { %9 = vsyncpa [#allocation6], 0 }
   0x2   :  { %10 = vsyncpa [#allocation4], 0  ;;  %s15_s14 = sshll.u32 %s314_s0, 4  ;;  %s275_s15 = smov [#allocation2]   ;;  %s16_s14 = int_to_ptr.hbm [resolvable:$true] %s15_s14 }
   0x3   :  { %s17_s16 = sshll.u32 %s275_s15, 4  ;;  %s28_s19 = sshll.u32 %s315_s1, 4  ;;  %s18_s16 = int_to_ptr.vmem [resolvable:$true] %s17_s16  ;;  %s29_s19 = int_to_ptr.hbm [resolvable:$true] %s28_s19 }
   0x4   :  { %s276_s20 = smov 256   ;;  %s277_s21 = smov 16  }
   0x5   :  { %23 = dma.hbm_to_vmem [thread:$0]  %s16_s14, 512, %s18_s16, [#allocation3], %s276_s20, %s276_s20, %s277_s21  }
   0x6   :  { %s278_s22 = smov [#allocation5]  }
   0x7   :  { %s30_s23 = sshll.u32 %s278_s22, 4  ;;  %s31_s23 = int_to_ptr.vmem [resolvable:$true] %s30_s23 }
   0x8   :  { %36 = dma.hbm_to_vmem [thread:$0]  %s29_s19, 4096, %s31_s23, [#allocation6], %s276_s20, %s276_s20, %s277_s21  }
   0x9   :  { %269 = dma.done.wait [#allocation3], 512  }
   0xa   :  { %270 = vsyncadd [#allocation3], 4294966784 }
   0xb   :  { %271 = dma.done.wait [#allocation6], 4096  }
   0xc   :  { %272 = vsyncadd [#allocation6], 4294963200  ;;  %v81_v0 = vld [vmem:[#allocation5 + $0xf0] sm:$0xff]  ;;  %v82_v1 = vld [vmem:[#allocation5 + $0xf8] sm:$0xff]  ;;  %s279_s24 = smov [#allocation7]   ;;  %s143_s28 = sshll.u32 %s317_s3, 4  ;;  %s144_s28 = int_to_ptr.hbm [resolvable:$true] %s143_s28 }
   0xd   :  { %157 = vmatpush.xpose.msra.mxu2 %v81_v0  ;;  %173 = vmatpush.xpose.msra.mxu3 %v82_v1  ;;  %v79_v2 = vld [vmem:[#allocation5 + $0xe0] sm:$0xff]  ;;  %v80_v3 = vld [vmem:[#allocation5 + $0xe8] sm:$0xff]  ;;  %v77_v4 = vld [vmem:[#allocation5 + $0xd0] sm:$0xff]  ;;  %s141_s25 = sshll.u32 %s279_s24, 4  ;;  %s281_s29 = smov 8   ;;  %s142_s25 = int_to_ptr.vmem [resolvable:$true] %s141_s25 }
   0xe   :  { %87 = vmatpush.xpose.msra.mxu0 %v81_v0  ;;  %110 = vmatpush.xpose.msra.mxu1 %v82_v1  ;;  %v78_v5 = vld [vmem:[#allocation5 + $0xd8] sm:$0xff]  ;;  %v75_v6 = vld [vmem:[#allocation5 + $0xc0] sm:$0xff]  ;;  %v76_v7 = vld [vmem:[#allocation5 + $0xc8] sm:$0xff] }
   0xf   :  { %v73_v8 = vld [vmem:[#allocation5 + $0xb0] sm:$0xff]  ;;  %v74_v9 = vld [vmem:[#allocation5 + $0xb8] sm:$0xff]  ;;  %v71_v10 = vld [vmem:[#allocation5 + $0xa0] sm:$0xff] }
  0x10   :  { %v72_v11 = vld [vmem:[#allocation5 + $0xa8] sm:$0xff]  ;;  %v69_v12 = vld [vmem:[#allocation5 + $0x90] sm:$0xff]  ;;  %v70_v13 = vld [vmem:[#allocation5 + $0x98] sm:$0xff] }
  0x11   :  { %158 = vmatpush.xpose.msra.mxu2 %v79_v2  ;;  %174 = vmatpush.xpose.msra.mxu3 %v80_v3  ;;  %v67_v14 = vld [vmem:[#allocation5 + $0x80] sm:$0xff]  ;;  %v68_v15 = vld [vmem:[#allocation5 + $0x88] sm:$0xff]  ;;  %v65_v16 = vld [vmem:[#allocation5 + $0x70] sm:$0xff] }
  0x12   :  { %88 = vmatpush.xpose.msra.mxu0 %v79_v2  ;;  %111 = vmatpush.xpose.msra.mxu1 %v80_v3  ;;  %v66_v17 = vld [vmem:[#allocation5 + $0x78] sm:$0xff]  ;;  %v63_v18 = vld [vmem:[#allocation5 + $0x60] sm:$0xff]  ;;  %v64_v19 = vld [vmem:[#allocation5 + $0x68] sm:$0xff] }
  0x13   :  { %v61_v20 = vld [vmem:[#allocation5 + $0x50] sm:$0xff]  ;;  %v62_v21 = vld [vmem:[#allocation5 + $0x58] sm:$0xff]  ;;  %v59_v22 = vld [vmem:[#allocation5 + $0x40] sm:$0xff] }
  0x14   :  { %v60_v23 = vld [vmem:[#allocation5 + $0x48] sm:$0xff]  ;;  %v57_v24 = vld [vmem:[#allocation5 + $0x30] sm:$0xff]  ;;  %v58_v25 = vld [vmem:[#allocation5 + $0x38] sm:$0xff] }
  0x15   :  { %159 = vmatpush.xpose.msra.mxu2 %v77_v4  ;;  %175 = vmatpush.xpose.msra.mxu3 %v78_v5  ;;  %v55_v26 = vld [vmem:[#allocation5 + $0x20] sm:$0xff]  ;;  %v56_v27 = vld [vmem:[#allocation5 + $0x28] sm:$0xff]  ;;  %v53_v28 = vld [vmem:[#allocation5 + $0x10] sm:$0xff] }
  0x16   :  { %89 = vmatpush.xpose.msra.mxu0 %v77_v4  ;;  %112 = vmatpush.xpose.msra.mxu1 %v78_v5  ;;  %v54_v29 = vld [vmem:[#allocation5 + $0x18] sm:$0xff]  ;;  %v51_v30 = vld [vmem:[#allocation5] sm:$0xff]  ;;  %v52_v31 = vld [vmem:[#allocation5 + $0x8] sm:$0xff] }
  0x17   :  { %v49_v32 = vld [vmem:[#allocation2 + $0x10] sm:$0xff]  ;;  %v50_v33 = vld [vmem:[#allocation2 + $0x18] sm:$0xff]  ;;  %v47_v34 = vld [vmem:[#allocation2] sm:$0xff] }
  0x18   :  { %v48_v35 = vld [vmem:[#allocation2 + $0x8] sm:$0xff]  ;;  %v196_v36 = vld [vmem:[%s316_s2] ss:$0 sm:$0xff]  ;;  %s280_s2 = smov 128  }
  0x19   :  { %160 = vmatpush.xpose.msra.mxu2 %v75_v6  ;;  %176 = vmatpush.xpose.msra.mxu3 %v76_v7 }
  0x1a   :  { %90 = vmatpush.xpose.msra.mxu0 %v75_v6  ;;  %113 = vmatpush.xpose.msra.mxu1 %v76_v7 }
  0x1d   :  { %161 = vmatpush.xpose.msra.mxu2 %v73_v8  ;;  %177 = vmatpush.xpose.msra.mxu3 %v74_v9 }
  0x1e   :  { %91 = vmatpush.xpose.msra.mxu0 %v73_v8  ;;  %114 = vmatpush.xpose.msra.mxu1 %v74_v9 }
  0x21   :  { %162 = vmatpush.xpose.msra.mxu2 %v71_v10  ;;  %178 = vmatpush.xpose.msra.mxu3 %v72_v11 }
  0x22   :  { %92 = vmatpush.xpose.msra.mxu0 %v71_v10  ;;  %115 = vmatpush.xpose.msra.mxu1 %v72_v11 }
  0x25   :  { %163 = vmatpush.xpose.msra.mxu2 %v69_v12  ;;  %179 = vmatpush.xpose.msra.mxu3 %v70_v13 }
  0x26   :  { %93 = vmatpush.xpose.msra.mxu0 %v69_v12  ;;  %116 = vmatpush.xpose.msra.mxu1 %v70_v13 }
  0x29   :  { %164 = vmatpush.xpose.msra.mxu2 %v67_v14  ;;  %180 = vmatpush.xpose.msra.mxu3 %v68_v15 }
  0x2a   :  { %94 = vmatpush.xpose.msra.mxu0 %v67_v14  ;;  %117 = vmatpush.xpose.msra.mxu1 %v68_v15 }
  0x2d   :  { %165 = vmatpush.xpose.msra.mxu2 %v65_v16  ;;  %181 = vmatpush.xpose.msra.mxu3 %v66_v17 }
  0x2e   :  { %95 = vmatpush.xpose.msra.mxu0 %v65_v16  ;;  %118 = vmatpush.xpose.msra.mxu1 %v66_v17 }
  0x31   :  { %166 = vmatpush.xpose.msra.mxu2 %v63_v18  ;;  %182 = vmatpush.xpose.msra.mxu3 %v64_v19 }
  0x32   :  { %96 = vmatpush.xpose.msra.mxu0 %v63_v18  ;;  %119 = vmatpush.xpose.msra.mxu1 %v64_v19 }
  0x35   :  { %167 = vmatpush.xpose.msra.mxu2 %v61_v20  ;;  %183 = vmatpush.xpose.msra.mxu3 %v62_v21 }
  0x36   :  { %97 = vmatpush.xpose.msra.mxu0 %v61_v20  ;;  %120 = vmatpush.xpose.msra.mxu1 %v62_v21 }
  0x39   :  { %168 = vmatpush.xpose.msra.mxu2 %v59_v22  ;;  %184 = vmatpush.xpose.msra.mxu3 %v60_v23 }
  0x3a   :  { %98 = vmatpush.xpose.msra.mxu0 %v59_v22  ;;  %121 = vmatpush.xpose.msra.mxu1 %v60_v23 }
  0x3d   :  { %169 = vmatpush.xpose.msra.mxu2 %v57_v24  ;;  %185 = vmatpush.xpose.msra.mxu3 %v58_v25 }
  0x3e   :  { %99 = vmatpush.xpose.msra.mxu0 %v57_v24  ;;  %122 = vmatpush.xpose.msra.mxu1 %v58_v25 }
  0x41   :  { %170 = vmatpush.xpose.msra.mxu2 %v55_v26  ;;  %186 = vmatpush.xpose.msra.mxu3 %v56_v27 }
  0x42   :  { %100 = vmatpush.xpose.msra.mxu0 %v55_v26  ;;  %123 = vmatpush.xpose.msra.mxu1 %v56_v27 }
  0x45   :  { %171 = vmatpush.xpose.msra.mxu2 %v53_v28  ;;  %187 = vmatpush.xpose.msra.mxu3 %v54_v29 }
  0x46   :  { %101 = vmatpush.xpose.msra.mxu0 %v53_v28  ;;  %124 = vmatpush.xpose.msra.mxu1 %v54_v29 }
  0x49   :  { %172 = vmatpush.xpose.msra.mxu2 %v51_v30  ;;  %188 = vmatpush.xpose.msra.mxu3 %v52_v31 }
  0x4a   :  { %102 = vmatpush.xpose.msra.mxu0 %v51_v30  ;;  %125 = vmatpush.xpose.msra.mxu1 %v52_v31 }
  0x4c   :  { %106 = vmatmul.f32.vlgmr.msra.gmra.mxu2 %v49_v32  ;;  %129 = vmatmul.f32.vlgmr.msra.gmra.mxu3 %v50_v33 }
  0x4d   :  { %103 = vmatmul.f32.vlgmr.msra.gmra.mxu0 %v47_v34  ;;  %126 = vmatmul.f32.vlgmr.msra.gmra.mxu1 %v48_v35 }
  0xca   :  { %v104_v37 = vpop.f32.mrf.mxu0  ;;  %v127_v38 = vpop.f32.mrf.mxu1 }
  0xcb   :  { %v105_v39 = vadd.f32 %v196_v36, %v104_v37 }
  0xcd   :  { %v128_v40 = vadd.f32 %v127_v38, %v105_v39 }
  0xcf   :  { %v107_v41 = vpop.f32.mrf.mxu2  ;;  %v133_v42 = vmax.f32 %v128_v40, 0.0  ;;  %v130_v43 = vpop.f32.mrf.mxu3 }
  0xd0   :  { %v108_v44 = vadd.f32 %v196_v36, %v107_v41 }
  0xd1   :  { %135 = vst [vmem:[#allocation7] sm:$0xff] %v133_v42 }
  0xd2   :  { %v131_v45 = vadd.f32 %v130_v43, %v108_v44 }
  0xd4   :  { %v134_v46 = vmax.f32 %v131_v45, 0.0 }
  0xd6   :  { %136 = vst [vmem:[#allocation7 + $0x8] sm:$0xff] %v134_v46 }
  0xd7   :  { %149 = dma.vmem_to_hbm [thread:$0]  %s142_s25, 256, %s144_s28, [#allocation4], %s280_s2, %s280_s2, %s281_s29  }
  0xd8   :  { %273 = dma.done.wait [#allocation4], 256  }
  0xd9   :  { %274 = vsyncadd [#allocation4], 4294967040 }
  0xda   :  { %154 = vsyncpa [#allocation3], 1 }
  0xdb   :  { %155 = vsyncpa [#allocation6], 1 }
  0xdc   :  { %156 = vsyncpa [#allocation4], 1 }

</bundles_post_ra>
